<compile_context>
chip_gen: v7x
topology: tpu7x:2x2x1
jax: 0.10.0
libtpu: 0.0.40
codegen_flags: <defaults>
</compile_context>

<pallas_src>
import math
from functools import partial
from types import SimpleNamespace

import numpy as np
import jax
import jax.numpy as jnp
from jax.experimental import pallas as pl
from jax.experimental.pallas import tpu as pltpu

BARRIER_EPS = 0.2            # barrier activation threshold on tet volume
DUMMY_EDGE = 10.0            # padded tets get volume DUMMY_EDGE^3/6 >> BARRIER_EPS
DEFAULT_L_TILE = 1024        # review: 1024 floor; 2048 where VMEM allows
DEFAULT_BARRIER_LANES = 512  # barrier tile = 8 sublanes * this many lanes of tets


def _round_up(a, b):
    return ((a + b - 1) // b) * b


# ---------------------------------------------------------------------------
# Main kernel: pipelined tiled (x^T @ L) + |.|^order partial sums
# ---------------------------------------------------------------------------
def _smooth_kernel(xhi_ref, xlo_ref, L_ref, out_ref, acc_ref, *, order, tile):
    # grid = (J, K): j = output-column tile of L ("parallel"),
    #                k = contraction tile ("arbitrary", innermost)
    k = pl.program_id(1)
    nk = pl.num_programs(1)

    @pl.when(k == 0)
    def _init():
        acc_ref[...] = jnp.zeros_like(acc_ref)

    # One contiguous bf16 (tile, tile) L tile per step; x stays resident and is
    # sliced in-kernel (no per-step x DMA).  Two M=8 bf16 matmuls (hi + lo
    # split of x) accumulate in f32 on the MXU — native bf16 path, no f32 cast
    # of the L tile.
    off = pl.multiple_of(k * tile, tile)
    l_tile = L_ref[...]                                   # (tile, tile) bf16
    hi = xhi_ref[:, pl.ds(off, tile)]                     # (8, tile) bf16
    lo = xlo_ref[:, pl.ds(off, tile)]                     # (8, tile) bf16
    acc_ref[...] += (jnp.dot(hi, l_tile, preferred_element_type=jnp.float32)
                     + jnp.dot(lo, l_tile, preferred_element_type=jnp.float32))

    # Finalize this column tile: |Lx|^order, folded lane-wise into a dense
    # (8, 128) block (full-lane unmasked store).  Glue sums everything.
    @pl.when(k == nk - 1)
    def _finalize():
        a = acc_ref[...]
        p = a * a                                         # |.|^2 (even power)
        if order == 4:
            p = p * p
        folded = p[:, 0:128]
        for c in range(1, tile // 128):
            folded = folded + p[:, c * 128:(c + 1) * 128]
        out_ref[...] = folded


def _smooth_pallas(xhi, xlo, L_blocks, order, tile):
    K, J = int(L_blocks.shape[0]), int(L_blocks.shape[1])
    Np = int(xhi.shape[1])

    # VMEM budget: double-buffered bf16 L tile + resident x hi/lo + out + acc.
    need = (2 * tile * tile * 2            # L double buffer (bf16)
            + 2 * 2 * 8 * Np * 2           # x hi/lo (bf16), conservative x2
            + 2 * 8 * 128 * 4              # output block double buffer
            + 8 * tile * 4                 # f32 accumulator scratch
            + (2 << 20))                   # headroom
    vmem_limit = int(min(48 << 20, max(32 << 20, need)))  # 48 MiB cap: safe on v7x

    return pl.pallas_call(
        partial(_smooth_kernel, order=order, tile=tile),
        out_shape=jax.ShapeDtypeStruct((8, J * 128), jnp.float32),
        grid=(J, K),
        in_specs=[
            pl.BlockSpec((8, Np), lambda j, k: (0, 0)),            # x hi (resident)
            pl.BlockSpec((8, Np), lambda j, k: (0, 0)),            # x lo (resident)
            pl.BlockSpec((None, None, tile, tile),                  # pre-blocked L:
                         lambda j, k: (k, j, 0, 0)),                # contiguous DMA / step
        ],
        out_specs=pl.BlockSpec((8, 128), lambda j, k: (0, j)),      # per-j partial block
        scratch_shapes=[pltpu.VMEM((8, tile), jnp.float32)],        # matmul accumulator
        compiler_params=pltpu.CompilerParams(
            dimension_semantics=("parallel", "arbitrary"),
            vmem_limit_bytes=vmem_limit),
        cost_estimate=pl.CostEstimate(
            flops=2 * 16 * Np * Np,
            transcendentals=0,
            bytes_accessed=Np * Np * 2 + 2 * 8 * Np * 2 + 8 * J * 128 * 4),
    )(xhi, xlo, L_blocks)


# ---------------------------------------------------------------------------
# Barrier kernel: tiled over tets, full-vreg VPU math
# ---------------------------------------------------------------------------
def _barrier_kernel(c_ref, out_ref, *, tbl):
    # c_ref: (12, 8, tbl) f32; row = coord*4 + vertex.  Each row slice is a
    # full (8, tbl) slab -> 8/8 sublane utilization for the cross products.
    def row(coord, vert):
        return c_ref[coord * 4 + vert]                    # (8, tbl)

    e1 = [row(c, 1) - row(c, 0) for c in range(3)]        # b - a
    e2 = [row(c, 2) - row(c, 0) for c in range(3)]        # c - a
    e3 = [row(c, 3) - row(c, 0) for c in range(3)]        # d - a
    cx = e2[1] * e3[2] - e2[2] * e3[1]
    cy = e2[2] * e3[0] - e2[0] * e3[2]
    cz = e2[0] * e3[1] - e2[1] * e3[0]
    vol = (e1[0] * cx + e1[1] * cy + e1[2] * cz) * (1.0 / 6.0)
    t = (BARRIER_EPS - vol) * (1.0 / BARRIER_EPS)
    bar = jnp.where(vol < BARRIER_EPS, t * t, jnp.zeros_like(t))

    folded = bar[:, 0:128]
    for c in range(1, tbl // 128):
        folded = folded + bar[:, c * 128:(c + 1) * 128]
    out_ref[...] = folded


def _barrier_pallas(corners, tbl):
    Tl = int(corners.shape[2])
    KT = Tl // tbl
    return pl.pallas_call(
        partial(_barrier_kernel, tbl=tbl),
        out_shape=jax.ShapeDtypeStruct((8, KT * 128), jnp.float32),
        grid=(KT,),
        in_specs=[pl.BlockSpec((12, 8, tbl), lambda t: (0, 0, t))],
        out_specs=pl.BlockSpec((8, 128), lambda t: (0, t)),
        compiler_params=pltpu.CompilerParams(dimension_semantics=("parallel",)),
    )(corners)


# ---------------------------------------------------------------------------
# Module-level wrapper (mirrors the PyTorch class interface)
# ---------------------------------------------------------------------------
class SmoothnessBarrierEnergy:
    def __init__(self, tet_v, tet_f, FLAGS, tile=DEFAULT_L_TILE,
                 barrier_lanes=DEFAULT_BARRIER_LANES):
        self.FLAGS = FLAGS
        self.tet_v = np.asarray(tet_v, dtype=np.float32)   # (N, 3)
        self.tet_f = np.asarray(tet_f, dtype=np.int32)     # (T, 4)

        N = self.tet_v.shape[0]
        T = self.tet_f.shape[0]
        self.N, self.T = N, T

        # --- tile selection: multiple of 128, clamped to the 128-padded N;
        #     Np padded to a multiple of the tile so large tiles always divide.
        req = max(128, (int(tile) // 128) * 128)
        Np128 = _round_up(N, 128)
        self.tile = min(req, Np128)
        self.Np = _round_up(N, self.tile)
        K = J = self.Np // self.tile

        # --- uniform graph Laplacian from tet edges (built once, numpy)
        L = np.zeros((N, N), dtype=np.float32)
        for ii, jj in ((0, 1), (0, 2), (0, 3), (1, 2), (1, 3), (2, 3)):
            a = self.tet_f[:, ii]
            b = self.tet_f[:, jj]
            L[a, b] = -1.0
            L[b, a] = -1.0
        np.fill_diagonal(L, 0.0)
        deg = -L.sum(axis=1)
        # bf16 holds -1 and integer degrees exactly only while deg <= 256.
        assert int(deg.max()) <= 256, "vertex degree > 256: bf16 L storage not exact"
        np.fill_diagonal(L, deg)
        self._L_f32 = L                                     # kept for reference checks

        # --- pre-blocked bf16 L in HBM: (K, J, tile, tile), block [k, j] is
        #     L[k*tile:(k+1)*tile, j*tile:(j+1)*tile] -> one contiguous DMA/step.
        L_pad = np.zeros((self.Np, self.Np), dtype=np.float32)
        L_pad[:N, :N] = L
        L_blocks = L_pad.reshape(K, self.tile, J, self.tile).transpose(0, 2, 1, 3)
        self.L_blocks = jnp.asarray(np.ascontiguousarray(L_blocks), dtype=jnp.bfloat16)

        # --- barrier corner layout: (12, 8, Tl) f32, row = coord*4 + vertex.
        #     Padded tet slots hold a large-volume dummy tet => barrier 0, no mask.
        self.TBL = max(128, (int(barrier_lanes) // 128) * 128)
        self.Tl = _round_up(max(T, 1), 8 * self.TBL) // 8
        fill = np.zeros((12, 8 * self.Tl), dtype=np.float32)
        for coord in range(3):
            fill[coord * 4 + (coord + 1), :] = DUMMY_EDGE   # vol = DUMMY_EDGE^3/6 >> eps
        self.corner_fill_flat = jnp.asarray(fill)

        self.tets_T = jnp.asarray(self.tet_f.T)             # (4, T) for coord-major gather

    def coeff_scheduler(self, it):
        smooth_coeff = self.FLAGS.smooth_eng_coeff
        barrier_coeff = self.FLAGS.barrier_coeff
        multiplier = math.pow(
            2, abs(math.sin(min(it / 300.0 / 4 * 0.5 * math.pi, 0.5 * math.pi))) * 4
        )
        return smooth_coeff * multiplier, barrier_coeff * multiplier

    def forward(self, x, it, c1, c2):
        order = 2
        if it > self.FLAGS.increase_order_iter:
            order = 4
        # NOTE: order is a Python value -> crossing increase_order_iter recompiles.

        N, T = self.N, self.T
        x = jnp.asarray(x, jnp.float32)
        xT = x.T                                                          # (3, N)
        xT_pad = jnp.zeros((8, self.Np), jnp.float32).at[:3, :N].set(xT)  # 8-sublane M

        # hi/lo bf16 split of x (~16 mantissa bits retained); L is exact in bf16,
        # so the bf16 MXU path stays within ~1e-4 of an f32 reference.
        xhi = xT_pad.astype(jnp.bfloat16)
        xlo = (xT_pad - xhi.astype(jnp.float32)).astype(jnp.bfloat16)

        # coordinate-major corner gather: row = coord*4 + vertex, then reshape
        # the tet axis into (8 sublanes, Tl lanes) for full-vreg barrier math.
        corners12 = xT[:, self.tets_T].reshape(12, T)
        corners = (self.corner_fill_flat.at[:, :T].set(corners12)
                   .reshape(12, 8, self.Tl))

        out_s = _smooth_pallas(xhi, xlo, self.L_blocks, order, self.tile)
        out_b = _barrier_pallas(corners, self.TBL)
        smooth = jnp.sum(out_s)
        barrier = jnp.sum(out_b)
        return c1 * smooth + c2 * barrier

    __call__ = forward


# ---------------------------------------------------------------------------
# Deterministic synthetic tet mesh + numpy (float64) reference
# ---------------------------------------------------------------------------
def build_tet_grid(n=3):
    coords = np.array(
        [[i, j, k] for i in range(n) for j in range(n) for k in range(n)],
        dtype=np.float32,
    )

    def vid(i, j, k):
        return (i * n + j) * n + k

    kuhn = [(0, 1, 3, 7), (0, 2, 3, 7), (0, 1, 5, 7), (0, 4, 5, 7), (0, 2, 6, 7), (0, 4, 6, 7)]
    tets = []
    for i in range(n - 1):
        for j in range(n - 1):
            for k in range(n - 1):
                c = [vid(i + di, j + dj, k + dk) for di in (0, 1) for dj in (0, 1) for dk in (0, 1)]
                for t in kuhn:
                    tets.append([c[t[0]], c[t[1]], c[t[2]], c[t[3]]])
    tets = np.array(tets, dtype=np.int32)

    # fix orientation so rest volumes are positive
    for idx in range(tets.shape[0]):
        a, b, c, d = coords[tets[idx]]
        vol = np.dot(b - a, np.cross(c - a, d - a)) / 6.0
        if vol < 0:
            tets[idx, 2], tets[idx, 3] = tets[idx, 3], tets[idx, 2]
    return coords, tets


def reference_energy_np(x, L, tets, c1, c2, order):
    x = np.asarray(x, np.float64)
    L = np.asarray(L, np.float64)
    Lx = L @ x
    smooth = np.sum(np.abs(Lx) ** order)
    corners = x[np.asarray(tets)]                          # (T, 4, 3)
    a, b, c, d = corners[:, 0], corners[:, 1], corners[:, 2], corners[:, 3]
    vol = np.einsum("ti,ti->t", b - a, np.cross(c - a, d - a)) / 6.0
    t = (BARRIER_EPS - vol) / BARRIER_EPS
    barrier = np.sum(np.where(vol < BARRIER_EPS, t * t, 0.0))
    return c1 * smooth + c2 * barrier


if __name__ == "__main__":
    FLAGS = SimpleNamespace(smooth_eng_coeff=1.0, barrier_coeff=0.5, increase_order_iter=100)

    tet_v, tet_f = build_tet_grid(n=7)          # 343 vertices, 1296 tets
    key = jax.random.PRNGKey(0)
    x = jnp.asarray(tet_v) + 0.02 * jax.random.normal(key, tet_v.shape, dtype=jnp.float32)
    x_np = np.asarray(x)

    # Tolerances: the bf16 hi/lo MXU path carries ~1e-4 relative error vs the
    # float64 numpy reference (review correctness note).
    RTOL, ATOL = 2e-3, 1e-3

    # --- small-tile instance: main grid (3, 3), barrier grid (2,) —
    #     exercises k-accumulation, multiple j output blocks and tet tiling.
    module = SmoothnessBarrierEnergy(tet_v, tet_f, FLAGS, tile=128, barrier_lanes=128)

    it = 10                                     # order = 2 branch
    c1, c2 = module.coeff_scheduler(it)
    eng = jax.block_until_ready(module.forward(x, it, c1, c2))
    ref = reference_energy_np(x_np, module._L_f32, tet_f, c1, c2, order=2)
    assert np.allclose(np.asarray(eng), ref, rtol=RTOL, atol=ATOL), (float(eng), ref)

    it4 = 200                                   # order = 4 branch
    c1b, c2b = module.coeff_scheduler(it4)
    eng4 = jax.block_until_ready(module.forward(x, it4, c1b, c2b))
    ref4 = reference_energy_np(x_np, module._L_f32, tet_f, c1b, c2b, order=4)
    assert np.allclose(np.asarray(eng4), ref4, rtol=RTOL, atol=ATOL), (float(eng4), ref4)

    # --- default-tile instance: tile clamps to the 128-padded N (384) ->
    #     main grid (1, 1), barrier grid (1,) — exercises the single-tile path.
    module_big = SmoothnessBarrierEnergy(tet_v, tet_f, FLAGS)   # tile=1024 requested
    eng_b = jax.block_until_ready(module_big.forward(x, it, c1, c2))
    assert np.allclose(np.asarray(eng_b), ref, rtol=RTOL, atol=ATOL), (float(eng_b), ref)

    eng_b4 = jax.block_until_ready(module_big.forward(x, it4, c1b, c2b))
    assert np.allclose(np.asarray(eng_b4), ref4, rtol=RTOL, atol=ATOL), (float(eng_b4), ref4)

    print("KERNEL_OK")
</pallas_src>

<mosaic_0001>
module attributes {stable_mosaic.version = 11 : i64} {
  func.func @_smooth_kernel(%arg0: i32, %arg1: i32, %arg2: memref<8x384xbf16, #tpu.memory_space<vmem>>, %arg3: memref<8x384xbf16, #tpu.memory_space<vmem>>, %arg4: memref<1x1x128x128xbf16, #tpu.memory_space<vmem>>, %arg5: memref<8x128xf32, #tpu.memory_space<vmem>>, %arg6: memref<8x128xf32, #tpu.memory_space<vmem>>) attributes {dimension_semantics = [#tpu.dimension_semantics<parallel>, #tpu.dimension_semantics<arbitrary>], iteration_bounds = array<i64: 3, 3>, scalar_prefetch = 0 : i64, scratch_operands = 1 : i64, tpu.core_type = #tpu.core_type<tc>, window_params = [{pipeline_mode = #tpu.pipeline_mode<synchronous>, transform_indices = @transform_0, window_bounds = array<i64: 8, 384>}, {pipeline_mode = #tpu.pipeline_mode<synchronous>, transform_indices = @transform_1, window_bounds = array<i64: 8, 384>}, {transform_indices = @transform_2, window_bounds = array<i64: 1, 1, 128, 128>}, {transform_indices = @transform_3, window_bounds = array<i64: 8, 128>}]} {
    %c0_i32 = arith.constant 0 : i32
    %0 = arith.cmpi eq, %arg1, %c0_i32 : i32
    %1 = arith.extui %0 : i1 to i32
    %c0_i32_0 = arith.constant 0 : i32
    %2 = arith.cmpi ne, %1, %c0_i32_0 : i32
    scf.if %2 {
      %cst_12 = arith.constant 0.000000e+00 : f32
      %20 = vector.broadcast %cst_12 : f32 to vector<8x128xf32>
      %c0_13 = arith.constant 0 : index
      %c0_14 = arith.constant 0 : index
      %21 = vector.load %arg6[%c0_13, %c0_14] : memref<8x128xf32, #tpu.memory_space<vmem>>, vector<8x128xf32>
      tpu.vector_store %arg6[%c0_13, %c0_14], %20 {strides = array<i32>} : memref<8x128xf32, #tpu.memory_space<vmem>>, vector<8x128xf32>,
    } else {
    }
    %c128_i32 = arith.constant 128 : i32
    %3 = arith.muli %arg1, %c128_i32 : i32
    %4 = tpu.assume_multiple %3, 128 : i32
    %c0 = arith.constant 0 : index
    %c0_1 = arith.constant 0 : index
    %c0_2 = arith.constant 0 : index
    %c0_3 = arith.constant 0 : index
    %5 = vector.load %arg4[%c0, %c0_1, %c0_2, %c0_3] : memref<1x1x128x128xbf16, #tpu.memory_space<vmem>>, vector<1x1x128x128xbf16>
    %6 = vector.shape_cast %5 : vector<1x1x128x128xbf16> to vector<128x128xbf16>
    %c0_4 = arith.constant 0 : index
    %7 = arith.index_cast %4 : i32 to index
    %8 = vector.load %arg2[%c0_4, %7] : memref<8x384xbf16, #tpu.memory_space<vmem>>, vector<8x128xbf16>
    %c0_5 = arith.constant 0 : index
    %9 = arith.index_cast %4 : i32 to index
    %10 = vector.load %arg3[%c0_5, %9] : memref<8x384xbf16, #tpu.memory_space<vmem>>, vector<8x128xbf16>
    %c0_6 = arith.constant 0 : index
    %c0_7 = arith.constant 0 : index
    %11 = vector.load %arg6[%c0_6, %c0_7] : memref<8x128xf32, #tpu.memory_space<vmem>>, vector<8x128xf32>
    %cst = arith.constant dense<0.000000e+00> : vector<8x128xf32>
    %12 = tpu.matmul %8, %6, %cst {dimension_numbers = #tpu.dot_dimension_numbers<[1], [0], [0], [1], [0, 0, 1, 1], [], []>} : vector<8x128xbf16>, vector<128x128xbf16>, vector<8x128xf32> -> vector<8x128xf32>
    %cst_8 = arith.constant dense<0.000000e+00> : vector<8x128xf32>
    %13 = tpu.matmul %10, %6, %cst_8 {dimension_numbers = #tpu.dot_dimension_numbers<[1], [0], [0], [1], [0, 0, 1, 1], [], []>} : vector<8x128xbf16>, vector<128x128xbf16>, vector<8x128xf32> -> vector<8x128xf32>
    %14 = arith.addf %12, %13 : vector<8x128xf32>
    %15 = arith.addf %11, %14 : vector<8x128xf32>
    %c0_9 = arith.constant 0 : index
    %c0_10 = arith.constant 0 : index
    %16 = vector.load %arg6[%c0_9, %c0_10] : memref<8x128xf32, #tpu.memory_space<vmem>>, vector<8x128xf32>
    tpu.vector_store %arg6[%c0_9, %c0_10], %15 {strides = array<i32>} : memref<8x128xf32, #tpu.memory_space<vmem>>, vector<8x128xf32>,
    %c2_i32 = arith.constant 2 : i32
    %17 = arith.cmpi eq, %arg1, %c2_i32 : i32
    %18 = arith.extui %17 : i1 to i32
    %c0_i32_11 = arith.constant 0 : i32
    %19 = arith.cmpi ne, %18, %c0_i32_11 : i32
    scf.if %19 {
      %c0_12 = arith.constant 0 : index
      %c0_13 = arith.constant 0 : index
      %20 = vector.load %arg6[%c0_12, %c0_13] : memref<8x128xf32, #tpu.memory_space<vmem>>, vector<8x128xf32>
      %21 = arith.mulf %20, %20 : vector<8x128xf32>
      %c0_14 = arith.constant 0 : index
      %c0_15 = arith.constant 0 : index
      %22 = vector.load %arg5[%c0_14, %c0_15] : memref<8x128xf32, #tpu.memory_space<vmem>>, vector<8x128xf32>
      tpu.vector_store %arg5[%c0_14, %c0_15], %21 {strides = array<i32>} : memref<8x128xf32, #tpu.memory_space<vmem>>, vector<8x128xf32>,
    } else {
    }
    return
  }
  func.func @transform_0(%arg0: i32, %arg1: i32) -> (i32, i32) {
    %c0_i32 = arith.constant 0 : i32
    %c0_i32_0 = arith.constant 0 : i32
    %c0_i32_1 = arith.constant 0 : i32
    return %c0_i32, %c0_i32_0 : i32, i32
  }
  func.func @transform_1(%arg0: i32, %arg1: i32) -> (i32, i32) {
    %c0_i32 = arith.constant 0 : i32
    %c0_i32_0 = arith.constant 0 : i32
    %c0_i32_1 = arith.constant 0 : i32
    return %c0_i32, %c0_i32_0 : i32, i32
  }
  func.func @transform_2(%arg0: i32, %arg1: i32) -> (i32, i32, i32, i32) {
    %c0_i32 = arith.constant 0 : i32
    %c0_i32_0 = arith.constant 0 : i32
    %c0_i32_1 = arith.constant 0 : i32
    return %arg1, %arg0, %c0_i32, %c0_i32_0 : i32, i32, i32, i32
  }
  func.func @transform_3(%arg0: i32, %arg1: i32) -> (i32, i32) {
    %c0_i32 = arith.constant 0 : i32
    %c0_i32_0 = arith.constant 0 : i32
    return %c0_i32, %arg0 : i32, i32
  }
}

</mosaic_0001>

<bundles_post_ra>
// kernel: tpu_custom_call.1
= control target key start
LH: loop header
LB: loop body
LE: loop exit
PB: predicated region body
PF: predicated region fallthrough
CT: control target
= control target key end

     0   :  { %s1302_s0 = inlined_call_operand.hbm [shape: bf16[8,384], index: 0, kind: input, shape index: {}]   ;;  %s1303_s1 = inlined_call_operand.hbm [shape: bf16[8,384], index: 1, kind: input, shape index: {}]   ;;  %s1304_s2 = inlined_call_operand.hbm [shape: bf16[3,3,128,128], index: 2, kind: input, shape index: {}]   ;;  %s1305_s3 = inlined_call_operand.hbm [shape: f32[8,384], index: 3, kind: output, shape index: {}]  }
   0x1   :  { %1315 = sst [smem:[#allocation18_spill]] %s1302_s0 }
   0x2   :  { %1316 = sst [smem:[#allocation19_spill]] %s1303_s1 }
   0x3   :  { %8 = vsyncpa [#allocation4], 0 }
   0x4   :  { %9 = vsyncpa [#allocation7], 0 }
   0x5   :  { %10 = vsyncpa [#allocation5], 0 }
   0x6   :  { %12 = vsyncpa [#allocation5 + $0x1], 0  ;;  %s991_s12 = smov 0   ;;  %s993_s13 = smov 0  }
   0x7   :  { %s995_s14 = smov 0   ;;  %s997_s15 = smov 0  }
   0x8   :  { %s999_s16 = smov 0   ;;  %s1001_s17 = smov 0  }
   0x9   :  { %s1003_s18 = smov 0   ;;  %s1005_s19 = smov 0  }
   0xa   :  { %s1007_s20 = smov 0   ;;  %s1009_s21 = smov 0  }
   0xb   :  { %s1011_s22 = smov 0  }
   0xc LB: > { %1317 = sst [smem:[#allocation14_spill]] %s920_s12  ;;  %s1045_s23 = sadd.s32 4294967295, %s960_s22   ;;  %s960_s22 = sphi %s1011_s22, %s18_s22   ;;  %s956_s21 = sphi %s1009_s21, %s1354_s21   ;;  %s952_s20 = sphi %s1007_s20, %s1353_s20   ;;  %s948_s19 = sphi %s1005_s19, %s1352_s19   ;;  %s944_s18 = sphi %s1003_s18, %s1351_s18   ;;  %s940_s17 = sphi %s1001_s17, %s1350_s17   ;;  %s936_s16 = sphi %s999_s16, %s1349_s16   ;;  %s932_s15 = sphi %s997_s15, %s1348_s15   ;;  %s928_s14 = sphi %s995_s14, %s1347_s14   ;;  %s924_s13 = sphi %s993_s13, %s1346_s13   ;;  %s920_s12 = sphi %s991_s12, %s1345_s12  }
   0xd   : > { %s519_s24 = sadd.s32 4294967294, %s960_s22   ;;  %p88_p0 = scmp.ne.s32.totalorder %s940_s17, %s936_s16 }
   0xe   : > { %p89_p1 = scmp.eq.s32.totalorder %s960_s22, 0  ;;  %p94_p2 = scmp.ne.s32.totalorder %s936_s16, %s932_s15 }
   0xf   : > { %p1306_p3 = scmp.eq.s32.totalorder %s1045_s23, 0  ;;  %p117_p5 = scmp.ne.s32.totalorder %s928_s14, %s924_s13 }
  0x10   : > { %p1055_p4 = por %p89_p1, %p88_p0  ;;  %p118_p7 = scmp.eq.s32.totalorder %s1045_s23, 8 }
  0x11   : > { %p1063_p6 = por %p1306_p3, %p94_p2  ;;  %p123_p8 = scmp.ne.s32.totalorder %s924_s13, %s920_s12 }
  0x12   : > { %p124_p9 = scmp.eq.s32.totalorder %s519_s24, 8  ;;  %p1070_p10 = por %p118_p7, %p117_p5 }
  0x13   : > { %s1319_s28 = scalar_select %p1063_p6, 1, 0 }
  0x14   : > { %s1320_s29 = scalar_select %p1070_p10, 1, 0 }
  0x15   : > { %p520_p11 = scmp.ge.s32.totalorder %s960_s22, 1  ;;  %p1075_p12 = por %p124_p9, %p123_p8 }
  0x16   : > { %p131_p13 = scmp.lt.s32.totalorder %s960_s22, 10  ;;  %s962_s5 = smov [#allocation3]  }
  0x17   : > { %s1321_s30 = scalar_select %p1075_p12, 1, 0 }
  0x18   : > { %p1080_p0 = pnand %p520_p11, %p131_p13  ;;  %s144_s6 = sshll.u32 %s962_s5, 4  ;;  %s145_s6 = int_to_ptr.vmem [resolvable:$true] %s144_s6 }
  0x19   : > { %1322 = sst [smem:[#allocation15_spill]] %s1321_s30  ;;  %p637_p2 = scmp.lt.s32.totalorder %s960_s22, 9 }
  0x1a   : > { %s1323_s4 = scalar_select %p1080_p0, 1, 0 }
  0x1b   : > { %p620_p1 = pneg %p1080_p0  ;;  %p1095_p7 = pnand %p637_p2, %p1055_p4 }
  0x1c   : > { %s963_s9 = smov [#allocation6]   ;;  %s1326_s0 = sld [smem:[#allocation18_spill]] }
  0x1d   : > { %p1089_p5 = pnand %p620_p1, %p1306_p3  ;;  %s155_s10 = sshll.u32 %s963_s9, 4  ;;  %s156_s10 = int_to_ptr.vmem [resolvable:$true] %s155_s10 }
  0x1e   : > { %s1325_s8 = scalar_select %p1095_p7, 1, 0 }
  0x1f   : > { %p746_p9 = pneg %p1089_p5 }
  0x22   : > { %s744_s24 = scalar_lea.hbm %s1326_s0, 192 }
  0x23   : > { %p745_p8 = scmp.ne.s32.totalorder %s1326_s0, %s744_s24  ;;  %p751_p4 = scmp.lt.u32.totalorder %s744_s24, %s1326_s0 }
  0x25   : > { %p747_p11 = pnand %p746_p9, %p745_p8 }
  0x27   : > { %p748_p13 = pneg %p747_p11 }
  0x29   : > { %p753_p1 = pnand %p751_p4, %p748_p13 }
  0x2b   : > { %756 = shalt.err (!%p753_p1)
}
  0x2c   : > { %s757_s9 = scalar_lea.vmem %s145_s6, 192  ;;  %p765_p10 = scmp.lt.s32.totalorder %s145_s6, %s145_s6 }
  0x2d   : > { %p758_p2 = scmp.ne.s32.totalorder %s145_s6, %s757_s9  ;;  %p766_p6 = scmp.lt.s32.totalorder %s757_s9, %s757_s9 }
  0x2f   : > { %p760_p3 = pnand %p758_p2, %p746_p9  ;;  %p767_p0 = por %p766_p6, %p765_p10 }
  0x31   : > { %p761_p12 = pneg %p760_p3 }
  0x33   : > { %p768_p7 = pnand %p767_p0, %p761_p12 }
  0x35   : > { %771 = shalt.err (!%p768_p7)
}
  0x36   : > { %623 = dma.hbm_to_vmem [thread:$0]  (!%p1089_p5), %s1326_s0, 192, %s145_s6, [#allocation4]  }
  0x37   : > { %s1327_s1 = sld [smem:[#allocation19_spill]] }
  0x3d   : > { %s772_s24 = scalar_lea.hbm %s1327_s1, 192 }
  0x3e   : > { %p773_p3 = scmp.ne.s32.totalorder %s1327_s1, %s772_s24  ;;  %p779_p12 = scmp.lt.u32.totalorder %s772_s24, %s1327_s1 }
  0x40   : > { %p775_p6 = pnand %p773_p3, %p746_p9 }
  0x42   : > { %p776_p10 = pneg %p775_p6 }
  0x44   : > { %p781_p0 = pnand %p779_p12, %p776_p10 }
  0x46   : > { %784 = shalt.err (!%p781_p0)
}
  0x47   : > { %s785_s6 = scalar_lea.vmem %s156_s10, 192  ;;  %p793_p13 = scmp.lt.s32.totalorder %s156_s10, %s156_s10 }
  0x48   : > { %p786_p7 = scmp.ne.s32.totalorder %s156_s10, %s785_s6  ;;  %p794_p4 = scmp.lt.s32.totalorder %s785_s6, %s785_s6 }
  0x4a   : > { %p788_p8 = pnand %p786_p7, %p746_p9  ;;  %p795_p1 = por %p794_p4, %p793_p13 }
  0x4c   : > { %p789_p11 = pneg %p788_p8 }
  0x4e   : > { %p796_p2 = pnand %p795_p1, %p789_p11 }
  0x50   : > { %799 = shalt.err (!%p796_p2)
}
  0x51   : > { %626 = dma.hbm_to_vmem [thread:$0]  (!%p1089_p5), %s1327_s1, 192, %s156_s10, [#allocation7]  }
  0x52   : > { %s30_s30 = sadd.s32 1, %s956_s21  ;;  %s27_s26 = sadd.s32 1, %s952_s20 }
  0x53   : > { %s166_s15 = sand.u32 1, %s960_s22   ;;  %p28_p9 = scmp.ge.s32.totalorder %s27_s26, 3 }
  0x54   : > { %s168_s24 = sand.u32 1, %s940_s17   ;;  %s525_s5 = sshll.u32 %s956_s21, 4 }
  0x55   : > { %s1356_s26 = smov (%p28_p9, %s27_s26), 0  ;;  %s1358_s30 = smov (!%p28_p9, %s30_s30), %s956_s21 }
  0x56   : > { %1328 = sst [smem:[#allocation16_spill]] %s1356_s26  ;;  %s76_s7 = ssub.s32 %s952_s20, %s1356_s26 }
  0x57   : > { %s524_s27 = sshll.u32 %s168_s24, 6  ;;  %p32_p3 = scmp.ge.s32.totalorder %s1358_s30, 3 }
  0x58   : > { %s607_s9 = smul.u32 48, %s952_s20  ;;  %s170_s10 = scalar_lea.vmem [#allocation8], %s524_s27 }
  0x59   : > { %s179_s6 = sshll.u32 %s170_s10, 4  ;;  %s1360_s30 = smov (%p32_p3, %s1358_s30), 0  ;;  %s1154_s6 = int_to_ptr.vmem [resolvable:$true] %s179_s6 }
  0x5a   : > { %1329 = sst [smem:[#allocation17_spill]] %s1360_s30  ;;  %s176_s25 = sadd.s32 %s607_s9, %s525_s5 }
  0x5b   : > { %s77_s11 = ssub.s32 %s956_s21, %s1360_s30  ;;  %s526_s0 = sshll.u32 %s176_s25, 6 }
  0x5c   : > { %s78_s1 = sor.u32 %s77_s11, %s76_s7  ;;  %p105_p5 = scmp.eq.s32.totalorder %s77_s11, 0 }
  0x5d   : > { %p79_p6 = scmp.eq.s32.totalorder %s78_s1, 0  ;;  %s1161_s24 = scalar_lea.hbm %s1304_s2, %s526_s0 }
  0x5e   : > { %s1330_s27 = sadd.s32 1, %s928_s14  ;;  %s1331_s5 = sadd.s32 1, %s940_s17 }
  0x5f   : > { %s1166_s10 = scalar_select %p105_p5, %s928_s14, %s1330_s27  }
  0x60   : > { %s1171_s9 = scalar_select %p79_p6, %s940_s17, %s1331_s5  }
  0x61   : > { %s1173_s30 = scalar_lea.sflag [#allocation4], %s166_s15  ;;  %s800_s7 = scalar_lea.hbm %s1161_s24, 1024 }
  0x62   : > { %p801_p10 = scmp.ne.s32.totalorder %s1161_s24, %s800_s7  ;;  %p1332_p12 = scmp.ne.s32.totalorder %s1325_s8, 0 }
  0x63   : > { %s805_s12 = scalar_lea.hbm %s1304_s2, 9216  ;;  %p806_p11 = scmp.lt.u32.totalorder %s1161_s24, %s1304_s2 }
  0x64   : > { %p802_p0 = pneg %p1332_p12  ;;  %p807_p13 = scmp.lt.u32.totalorder %s805_s12, %s800_s7 }
  0x65   : > { %p809_p1 = scmp.lt.u32.totalorder %s800_s7, %s1161_s24 }
  0x66   : > { %p803_p7 = pnand %p802_p0, %p801_p10  ;;  %p808_p4 = por %p807_p13, %p806_p11 }
  0x68   : > { %p804_p8 = pneg %p803_p7  ;;  %p810_p2 = por %p809_p1, %p808_p4 }
  0x6a   : > { %p811_p9 = pnand %p810_p2, %p804_p8 }
  0x6c   : > { %814 = shalt.err (!%p811_p9)
}
  0x6d   : > { %s815_s15 = scalar_lea.vmem %s1154_s6, 1024  ;;  %s964_s11 = smov [#allocation8]  }
  0x6e   : > { %p816_p3 = scmp.ne.s32.totalorder %s1154_s6, %s815_s15  ;;  %s820_s27 = sshll.u32 %s964_s11, 4  ;;  %s821_s27 = int_to_ptr.vmem [resolvable:$false] %s820_s27 }
  0x6f   : > { %s822_s5 = scalar_lea.vmem %s821_s27, 2048  ;;  %p823_p10 = scmp.lt.s32.totalorder %s1154_s6, %s821_s27 }
  0x70   : > { %p818_p5 = pnand %p816_p3, %p802_p0  ;;  %p824_p7 = scmp.lt.s32.totalorder %s822_s5, %s815_s15 }
  0x72   : > { %p819_p6 = pneg %p818_p5  ;;  %p825_p11 = por %p824_p7, %p823_p10 }
  0x74   : > { %p826_p13 = pnand %p825_p11, %p819_p6 }
  0x76   : > { %829 = shalt.err (!%p826_p13)
}
  0x77   : > { %s965_s7 = smov 64   ;;  %s966_s0 = smov 4  }
  0x78   : > { %630 = dma.hbm_to_vmem [thread:$0]  (!%p1332_p12), %s1161_s24, 1024, %s1154_s6, %s1173_s30, %s965_s7, %s965_s7, %s966_s0  }
  0x79   : > { %p1333_p0 = scmp.ne.s32.totalorder %s1323_s4, 0 }
  0x7a   : > { %p1334_p8 = scmp.eq.s32.totalorder (!%p1333_p0), %s1045_s23, 0 }
  0x7b   : > { %191 = sbr.rel (%p1333_p0) target bundleno = 434 (0x1b2), region = 32 }
  0x82   : > { %903 = dma.done.wait (%p1334_p8), [#allocation4], 192   ;;  %p1335_p4 = pmov %p1334_p8 }
  0x84   : > { %905 = vsyncadd (%p1335_p4), [#allocation4], 4294967104  ;;  %p1336_p1 = pmov %p1335_p4 }
  0x86   : > { %907 = dma.done.wait (%p1336_p1), [#allocation7], 192   ;;  %p1337_p2 = pmov %p1336_p1 }
  0x87   : > { %s201_s8 = sand.u32 1, %s1045_s23   ;;  %s203_s30 = sand.u32 1, %s936_s16  }
  0x88   : > { %909 = vsyncadd (%p1337_p2), [#allocation7], 4294967104  ;;  %s530_s6 = sshll.u32 %s203_s30, 6  ;;  %s202_s4 = scalar_lea.sflag [#allocation4], %s201_s8 }
  0x89   : > { %s1213_s24 = scalar_lea.vmem [#allocation8], %s530_s6  ;;  %p1338_p12 = scmp.ne.s32.totalorder %s1319_s28, 0 }
  0x8b   : > { %911 = dma.done.wait (%p1338_p12), %s202_s4, 1024  }
  0x8c   : > { %913 = vsyncadd (%p1338_p12), %s202_s4, 4294966272  ;;  %s225_s1 = sand.u32 1, %s924_s13   ;;  %p532_p9 = scmp.ne.s32.totalorder %s944_s18, 0 }
  0x8d   : > { %s1222_s12 = sshll.u32 %s225_s1, 3  ;;  %v967_v0 = vmov (!%p532_p9), 0.0  }
  0x8e   : > { %s227_s26 = scalar_lea.vmem [#allocation9], %s1222_s12  ;;  %232 = sbr.rel (%p532_p9) target bundleno = 149 (0x95), region = 48  ;;  %233 = vst [vmem:[#allocation2] sm:$0xff] (!%p532_p9), %v967_v0 }
  0x95 PF: > { %v736_v1 = vld [vmem:[%s1213_s24] sm:$0xff]   ;;  %v968_v2 = vmov 0.0   ;;  %v737_v3 = vld [vmem:[%s1213_s24 + $0x8] sm:$0xff]   ;;  %vm969_vm0 = vmmov 0   ;;  %v738_v4 = vld [vmem:[%s1213_s24 + $0x10] sm:$0xff]   ;;  %s533_s23 = sshll.u32 %s944_s18, 7 }
  0x96   : > { %567 = vmatprep.subr.bf16.mxu0 %v968_v2  ;;  %587 = vmatprep.subr.bf16.mxu1 %v968_v2  ;;  %v739_v5 = vld [vmem:[%s1213_s24 + $0x18] sm:$0xff]   ;;  %v740_v6 = vld [vmem:[%s1213_s24 + $0x20] sm:$0xff]   ;;  %v741_v7 = vld [vmem:[%s1213_s24 + $0x28] sm:$0xff]   ;;  %s251_s28 = sshra.s32 %s533_s23, 7  ;;  %p544_p3 = scmp.ne.s32.totalorder %s944_s18, 2 }
  0x97   : > { %568 = vmatpush3.bf16.msra.mxu0 %v736_v1  ;;  %588 = vmatpush3.bf16.msra.mxu1 %v736_v1  ;;  %v742_v8 = vld [vmem:[%s1213_s24 + $0x30] sm:$0xff]   ;;  %s534_s25 = sshll.u32 %s251_s28, 2  ;;  %v743_v9 = vld [vmem:[%s1213_s24 + $0x38] sm:$0xff]   ;;  %v259_v13 = vld [vmem:[#allocation2] sm:$0xff] }
  0x98   : > { %569 = vmatprep.subr.bf16.mxu0 %v968_v2  ;;  %589 = vmatprep.subr.bf16.mxu1 %v968_v2  ;;  %s257_s15 = scalar_lea.vmem [#allocation6], %s534_s25  ;;  %s254_s11 = scalar_lea.vmem [#allocation3], %s534_s25 }
  0x99   : > { %583 = vmatprep.mubr.msk.bf16.mxu0 %vm969_vm0, %v968_v2  ;;  %603 = vmatprep.mubr.msk.bf16.mxu1 %vm969_vm0, %v968_v2  ;;  %v258_v10 = vld [vmem:[%s257_s15] sm:$0xf] }
  0x9a   : > { %v255_v11 = vld [vmem:[%s254_s11] sm:$0xf] }
  0x9b   : > { %570 = vmatpush3.bf16.msra.mxu0 %v737_v3  ;;  %590 = vmatpush3.bf16.msra.mxu1 %v737_v3 }
  0x9c   : > { %571 = vmatprep.subr.bf16.mxu0 %v968_v2  ;;  %591 = vmatprep.subr.bf16.mxu1 %v968_v2 }
  0x9f   : > { %572 = vmatpush3.bf16.msra.mxu0 %v738_v4  ;;  %592 = vmatpush3.bf16.msra.mxu1 %v738_v4 }
  0xa0   : > { %573 = vmatprep.subr.bf16.mxu0 %v968_v2  ;;  %593 = vmatprep.subr.bf16.mxu1 %v968_v2 }
  0xa3   : > { %574 = vmatpush3.bf16.msra.mxu0 %v739_v5  ;;  %594 = vmatpush3.bf16.msra.mxu1 %v739_v5 }
  0xa4   : > { %575 = vmatprep.subr.bf16.mxu0 %v968_v2  ;;  %595 = vmatprep.subr.bf16.mxu1 %v968_v2 }
  0xa7   : > { %576 = vmatpush3.bf16.msra.mxu0 %v740_v6  ;;  %596 = vmatpush3.bf16.msra.mxu1 %v740_v6 }
  0xa8   : > { %577 = vmatprep.subr.bf16.mxu0 %v968_v2  ;;  %597 = vmatprep.subr.bf16.mxu1 %v968_v2 }
  0xab   : > { %578 = vmatpush3.bf16.msra.mxu0 %v741_v7  ;;  %598 = vmatpush3.bf16.msra.mxu1 %v741_v7 }
  0xac   : > { %579 = vmatprep.subr.bf16.mxu0 %v968_v2  ;;  %599 = vmatprep.subr.bf16.mxu1 %v968_v2 }
  0xaf   : > { %580 = vmatpush3.bf16.msra.mxu0 %v742_v8  ;;  %600 = vmatpush3.bf16.msra.mxu1 %v742_v8 }
  0xb0   : > { %581 = vmatprep.subr.bf16.mxu0 %v968_v2  ;;  %601 = vmatprep.subr.bf16.mxu1 %v968_v2 }
  0xb3   : > { %582 = vmatpush3.bf16.msra.mxu0 %v743_v9  ;;  %602 = vmatpush3.bf16.msra.mxu1 %v743_v9 }
  0xb6   : > { %584 = vmatmul.mubr.bf16.vlgmr.msra.gmra.mrb[0].mxu0 %v258_v10  ;;  %604 = vmatmul.mubr.bf16.vlgmr.msra.gmra.mrb[0].mxu1 %v255_v11 }
 0x188   : > { %393 = sbr.rel (%p544_p3) target bundleno = 409 (0x199), region = 52 }
 0x189   : > { %v342_v12 = vpop.f32.mrb[0].mxu0  ;;  %v382_v14 = vpop.f32.mrb[0].mxu1 }
 0x18a   : > { %v383_v15 = vadd.f32 %v382_v14, %v342_v12  ;;  %v585_v16 = vpop.f32.mrb[1].mxu0  ;;  %v605_v17 = vpop.f32.mrb[1].mxu1 }
 0x18b   : > { %v345_v18 = vpop.f32.mrb[2].mxu0  ;;  %v385_v19 = vpop.f32.mrb[2].mxu1 }
 0x18c   : > { %v388_v20 = vadd.f32 %v383_v15, %v259_v13  ;;  %v586_v21 = vpop.f32.mrb[3].mxu0  ;;  %v606_v22 = vpop.f32.mrb[3].mxu1 }
 0x18e   : > { %389 = vst [vmem:[#allocation2] sm:$0xff] %v388_v20 }
 0x195   : > { %v394_v23 = vld [vmem:[#allocation2] sm:$0xff] }
 0x196   : > { %v395_v24 = vmul.f32 %v394_v23, %v394_v23 }
 0x198   : > { %396 = vst [vmem:[%s227_s26] sm:$0xff] %v395_v24 }
 0x199 PF: > { %s546_s27 = sshll.u32 %s948_s19, 7  ;;  %s411_s8 = sshll.u32 %s227_s26, 4  ;;  %s412_s8 = int_to_ptr.vmem [resolvable:$true] %s411_s8 }
 0x19a   : > { %s1242_s0 = scalar_lea.hbm %s1305_s3, %s546_s27  ;;  %s398_s18 = scalar_lea.sflag [#allocation5], %s225_s1 }
 0x19b   : > { %s830_s30 = scalar_lea.vmem %s412_s8, 128  ;;  %p1339_p6 = scmp.ne.s32.totalorder %s1320_s29, 0 }
 0x19c   : > { %p831_p5 = scmp.ne.s32.totalorder %s412_s8, %s830_s30  ;;  %s970_s6 = smov [#allocation9]  }
 0x19d   : > { %s834_s4 = sshll.u32 %s970_s6, 4  ;;  %s835_s4 = int_to_ptr.vmem [resolvable:$false] %s834_s4 }
 0x19e   : > { %p832_p10 = pnand %p831_p5, %p1339_p6  ;;  %s836_s24 = scalar_lea.vmem %s835_s4, 256 }
 0x19f   : > { %p837_p11 = scmp.lt.s32.totalorder %s412_s8, %s835_s4  ;;  %p838_p13 = scmp.lt.s32.totalorder %s836_s24, %s830_s30 }
 0x1a0   : > { %p833_p7 = pneg %p832_p10 }
 0x1a1   : > { %p839_p0 = por %p838_p13, %p837_p11 }
 0x1a3   : > { %p840_p8 = pnand %p839_p0, %p833_p7 }
 0x1a5   : > { %843 = shalt.err (!%p840_p8)
}
 0x1a6   : > { %s844_s19 = scalar_lea.hbm %s1242_s0, 128  ;;  %s848_s26 = scalar_lea.hbm %s1305_s3, 384 }
 0x1a7   : > { %p845_p4 = scmp.ne.s32.totalorder %s1242_s0, %s844_s19  ;;  %p849_p12 = scmp.lt.u32.totalorder %s1242_s0, %s1305_s3 }
 0x1a8   : > { %p850_p9 = scmp.lt.u32.totalorder %s848_s26, %s844_s19  ;;  %p852_p5 = scmp.lt.u32.totalorder %s844_s19, %s1242_s0 }
 0x1a9   : > { %p846_p1 = pnand %p845_p4, %p1339_p6 }
 0x1aa   : > { %p851_p3 = por %p850_p9, %p849_p12 }
 0x1ab   : > { %p847_p2 = pneg %p846_p1 }
 0x1ac   : > { %p853_p10 = por %p852_p5, %p851_p3 }
 0x1ae   : > { %p854_p7 = pnand %p853_p10, %p847_p2 }
 0x1b0   : > { %857 = shalt.err (!%p854_p7)
}
 0x1b1   : > { %618 = dma.vmem_to_hbm [thread:$0]  (%p1339_p6), %s412_s8, 128, %s1242_s0, %s398_s18  }
 0x1b2 PF: > { %s1340_s25 = sld [smem:[#allocation14_spill]]  ;;  %s1341_s15 = sld [smem:[#allocation15_spill]] }
 0x1b3   : > { %p640_p11 = scmp.ge.s32.totalorder %s960_s22, 2 }
 0x1b8   : > { %s423_s11 = sand.u32 1, %s1340_s25   ;;  %p1342_p13 = scmp.ne.s32.totalorder %s1341_s15, 0 }
 0x1b9   : > { %s424_s27 = scalar_lea.sflag [#allocation5], %s423_s11 }
 0x1ba   : > { %p632_p0 = pnand %p640_p11, %p1342_p13 }
 0x1bc   : > { %915 = dma.done.wait (!%p632_p0), %s424_s27, 128  }
 0x1bd   : > { %917 = vsyncadd (!%p632_p0), %s424_s27, 4294967168  ;;  %s18_s22 = sadd.s32 1, %s960_s22   ;;  %s1343_s29 = sld [smem:[#allocation16_spill]] }
 0x1be   : > { %p15_p8 = scmp.ge.s32.totalorder %s18_s22, 11   ;;  %s1344_s5 = sld [smem:[#allocation17_spill]] }
 0x1bf   : > { %s1345_s12 = smov %s924_s13  ;;  %s1346_s13 = smov %s928_s14 }
 0x1c0   : > { %s1347_s14 = smov %s1166_s10  ;;  %s1348_s15 = smov %s936_s16 }
 0x1c1   : > { %s1349_s16 = smov %s940_s17  ;;  %s1350_s17 = smov %s1171_s9 }
 0x1c2   : > { %s1351_s18 = smov %s952_s20  ;;  %s1352_s19 = smov %s956_s21 }
 0x1c3   : > { %s1353_s20 = smov %s1343_s29  ;;  %17 = sbr.rel (!%p15_p8) target bundleno = 12 (0xc), region = 94 }
 0x1c4   : > { %s1354_s21 = smov %s1344_s5 }
 0x1ca   :  { %429 = vsyncpa [#allocation4], 1 }
 0x1cb   :  { %431 = vsyncpa [#allocation4 + $0x1], 1 }
 0x1cc   :  { %432 = vsyncpa [#allocation7], 1 }
 0x1cd   :  { %433 = vsyncpa [#allocation5], 1 }
 0x1ce   :  { %435 = vsyncpa [#allocation5 + $0x1], 1 }

</bundles_post_ra>
